<compile_context>
chip_gen: v5e
topology: v5e:2x2
jax: 0.10.0
libtpu: 0.0.40
codegen_flags: <defaults>
</compile_context>

<pallas_src>
import functools
import math

import jax
import jax.numpy as jnp
from jax.experimental import pallas as pl


def _gesture_encoder_kernel(
    x_ref,      # (B*S, D)   flattened batch of rows
    wqkv_ref,   # (D, 3D)    fused [Wq | Wk | Wv]
    bqkv_ref,   # (1, 3D)
    wf_ref,     # (D, Cpad)  Wo @ Wc, zero-padded to 128 lanes
    bf_ref,     # (1, Cpad)  bo @ Wc + bc, zero-padded
    o_ref,      # (B, Cpad)
    *, num_heads: int, batch: int, seq: int,
):
    x = x_ref[...]                                   # (B*S, D) f32
    D = x.shape[-1]
    H = num_heads
    dh = D // H
    scale = 1.0 / math.sqrt(dh)

    # Single fused QKV projection (one MXU push, N = 3D).
    qkv = jnp.dot(x, wqkv_ref[...], preferred_element_type=jnp.float32) + bqkv_ref[0]
    q = qkv[:, 0 * D:1 * D]
    k = qkv[:, 1 * D:2 * D]
    v = qkv[:, 2 * D:3 * D]

    # Per-head attention, batched over the batch dim with 3-D einsums.
    pooled_heads = []
    for h in range(H):
        sl = slice(h * dh, (h + 1) * dh)
        qh = q[:, sl].reshape(batch, seq, dh)        # leading-dim split only
        kh = k[:, sl].reshape(batch, seq, dh)
        vh = v[:, sl].reshape(batch, seq, dh)

        s = jnp.einsum("bqd,bkd->bqk", qh, kh,
                       preferred_element_type=jnp.float32) * scale   # (B, S, S)
        s = s - jnp.max(s, axis=-1, keepdims=True)
        p = jnp.exp(s)
        p = p * pl.reciprocal(jnp.sum(p, axis=-1, keepdims=True), approx=True)

        # Pool over queries first (pooling is linear), then a per-batch GEMV.
        pbar = jnp.mean(p, axis=1, keepdims=True)                     # (B, 1, S)
        ph = jnp.einsum("bqk,bkd->bqd", pbar, vh,
                        preferred_element_type=jnp.float32)           # (B, 1, dh)
        pooled_heads.append(ph[:, 0, :])                              # (B, dh)

    pooled = jnp.concatenate(pooled_heads, axis=-1)                   # (B, D) == mean_S(ctx)

    # Folded output-projection + classifier: one small GEMM into a 128-lane slab.
    o_ref[...] = (jnp.dot(pooled, wf_ref[...],
                          preferred_element_type=jnp.float32) + bf_ref[0])


def gesture_encoder(x, params, *, num_heads):
    """x: (B, S, D) float32 -> (B, C) float32."""
    B, S, D = x.shape
    assert D % num_heads == 0, "num_heads must divide the hidden size"
    C = params["w_cls"].shape[1]
    C_pad = ((C + 127) // 128) * 128

    # Host-side weight fusion / folding (plain XLA ops, done once).
    wqkv = jnp.concatenate([params["wq"], params["wk"], params["wv"]], axis=1)   # (D, 3D)
    bqkv = jnp.concatenate([params["bq"], params["bk"], params["bv"]], axis=1)   # (1, 3D)
    w_f = params["wo"] @ params["w_cls"]                                         # (D, C)
    b_f = params["bo"] @ params["w_cls"] + params["b_cls"]                       # (1, C)
    w_f = jnp.pad(w_f, ((0, 0), (0, C_pad - C)))                                 # (D, Cpad)
    b_f = jnp.pad(b_f, ((0, 0), (0, C_pad - C)))                                 # (1, Cpad)

    xr = x.reshape(B * S, D)   # B*S rows (multiple of 8 sublanes at the toy shapes)

    kernel = functools.partial(
        _gesture_encoder_kernel, num_heads=num_heads, batch=B, seq=S)

    # No grid: whole problem in a single invocation; all operands live in VMEM.
    out = pl.pallas_call(
        kernel,
        out_shape=jax.ShapeDtypeStruct((B, C_pad), jnp.float32),
    )(xr, wqkv, bqkv, w_f, b_f)

    return out[:, :C]


def _reference(x, params, *, num_heads):
    """Pure-JAX reference (unfused) for correctness checking."""
    B, S, D = x.shape
    dh = D // num_heads
    q = x @ params["wq"] + params["bq"]
    k = x @ params["wk"] + params["bk"]
    v = x @ params["wv"] + params["bv"]
    qh = q.reshape(B, S, num_heads, dh).transpose(0, 2, 1, 3)
    kh = k.reshape(B, S, num_heads, dh).transpose(0, 2, 1, 3)
    vh = v.reshape(B, S, num_heads, dh).transpose(0, 2, 1, 3)
    s = jnp.einsum("bhqd,bhkd->bhqk", qh, kh) / math.sqrt(dh)
    p = jax.nn.softmax(s, axis=-1)
    ctx = jnp.einsum("bhqk,bhkd->bhqd", p, vh).transpose(0, 2, 1, 3).reshape(B, S, D)
    attn_out = ctx @ params["wo"] + params["bo"]
    pooled = attn_out.mean(axis=-2)
    return pooled @ params["w_cls"] + params["b_cls"][0]


def make_params(key, D, C):
    keys = jax.random.split(key, 10)
    init = lambda k, shape: (0.02 * jax.random.normal(k, shape)).astype(jnp.float32)
    return {
        "wq": init(keys[0], (D, D)), "bq": init(keys[1], (1, D)),
        "wk": init(keys[2], (D, D)), "bk": init(keys[3], (1, D)),
        "wv": init(keys[4], (D, D)), "bv": init(keys[5], (1, D)),
        "wo": init(keys[6], (D, D)), "bo": init(keys[7], (1, D)),
        "w_cls": init(keys[8], (D, C)), "b_cls": init(keys[9], (1, C)),
    }


if __name__ == "__main__":
    B, S, D, H, C = 2, 8, 32, 4, 10
    key = jax.random.PRNGKey(0)
    kx, kp = jax.random.split(key)
    x = jax.random.normal(kx, (B, S, D), dtype=jnp.float32)
    params = make_params(kp, D, C)

    out = gesture_encoder(x, params, num_heads=H)
    out = jax.block_until_ready(out)

    ref = _reference(x, params, num_heads=H)
    assert out.shape == (B, C)
    assert jnp.allclose(out, ref, atol=1e-4, rtol=1e-3), "mismatch vs reference"
    print("KERNEL_OK")
</pallas_src>

<mosaic_0001>
module attributes {stable_mosaic.version = 11 : i64} {
  func.func @_gesture_encoder_kernel(%arg0: memref<16x32xf32, #tpu.memory_space<vmem>>, %arg1: memref<32x96xf32, #tpu.memory_space<vmem>>, %arg2: memref<1x96xf32, #tpu.memory_space<vmem>>, %arg3: memref<32x128xf32, #tpu.memory_space<vmem>>, %arg4: memref<1x128xf32, #tpu.memory_space<vmem>>, %arg5: memref<2x128xf32, #tpu.memory_space<vmem>>) attributes {dimension_semantics = [], scalar_prefetch = 0 : i64, scratch_operands = 0 : i64, tpu.core_type = #tpu.core_type<tc>} {
    %c0 = arith.constant 0 : index
    %c0_0 = arith.constant 0 : index
    %0 = vector.load %arg0[%c0, %c0_0] : memref<16x32xf32, #tpu.memory_space<vmem>>, vector<16x32xf32>
    %c0_1 = arith.constant 0 : index
    %c0_2 = arith.constant 0 : index
    %1 = vector.load %arg1[%c0_1, %c0_2] : memref<32x96xf32, #tpu.memory_space<vmem>>, vector<32x96xf32>
    %cst = arith.constant dense<0.000000e+00> : vector<16x96xf32>
    %2 = tpu.matmul %0, %1, %cst {dimension_numbers = #tpu.dot_dimension_numbers<[1], [0], [0], [1], [0, 0, 1, 1], [], []>} : vector<16x32xf32>, vector<32x96xf32>, vector<16x96xf32> -> vector<16x96xf32>
    %c0_3 = arith.constant 0 : index
    %c0_4 = arith.constant 0 : index
    %3 = vector.load %arg2[%c0_3, %c0_4] : memref<1x96xf32, #tpu.memory_space<vmem>>, vector<1x96xf32>
    %4 = vector.shape_cast %3 : vector<1x96xf32> to vector<96xf32>
    %5 = vector.shape_cast %4 : vector<96xf32> to vector<1x96xf32>
    %6 = vector.broadcast %5 : vector<1x96xf32> to vector<16x96xf32>
    %7 = arith.addf %2, %6 : vector<16x96xf32>
    %8 = vector.extract_strided_slice %7 {offsets = [0, 0], sizes = [16, 32], strides = [1, 1]} : vector<16x96xf32> to vector<16x32xf32>
    %9 = vector.extract_strided_slice %7 {offsets = [0, 32], sizes = [16, 32], strides = [1, 1]} : vector<16x96xf32> to vector<16x32xf32>
    %10 = vector.extract_strided_slice %7 {offsets = [0, 64], sizes = [16, 32], strides = [1, 1]} : vector<16x96xf32> to vector<16x32xf32>
    %11 = vector.extract_strided_slice %8 {offsets = [0, 0], sizes = [16, 8], strides = [1, 1]} : vector<16x32xf32> to vector<16x8xf32>
    %12 = vector.shape_cast %11 : vector<16x8xf32> to vector<2x8x8xf32>
    %13 = vector.extract_strided_slice %9 {offsets = [0, 0], sizes = [16, 8], strides = [1, 1]} : vector<16x32xf32> to vector<16x8xf32>
    %14 = vector.shape_cast %13 : vector<16x8xf32> to vector<2x8x8xf32>
    %15 = vector.extract_strided_slice %10 {offsets = [0, 0], sizes = [16, 8], strides = [1, 1]} : vector<16x32xf32> to vector<16x8xf32>
    %16 = vector.shape_cast %15 : vector<16x8xf32> to vector<2x8x8xf32>
    "tpu.trace_start"() <{level = 10 : i32, message = "bqd,bkd->bqk"}> : () -> ()
    %cst_5 = arith.constant dense<0.000000e+00> : vector<2x8x8xf32>
    %17 = tpu.matmul %12, %14, %cst_5 {dimension_numbers = #tpu.dot_dimension_numbers<[2], [2], [1], [1], [0, 0, 0, 1, 1, 1], [0], [0]>} : vector<2x8x8xf32>, vector<2x8x8xf32>, vector<2x8x8xf32> -> vector<2x8x8xf32>
    "tpu.trace_stop"() : () -> ()
    %cst_6 = arith.constant 0.353553385 : f32
    %18 = vector.broadcast %cst_6 : f32 to vector<2x8x8xf32>
    %19 = arith.mulf %17, %18 : vector<2x8x8xf32>
    %cst_7 = arith.constant dense<0xFF800000> : vector<2x8xf32>
    %20 = vector.multi_reduction <maximumf>, %19, %cst_7 [2] : vector<2x8x8xf32> to vector<2x8xf32>
    %21 = vector.shape_cast %20 : vector<2x8xf32> to vector<2x8x1xf32>
    %22 = vector.broadcast %21 : vector<2x8x1xf32> to vector<2x8x8xf32>
    %23 = arith.subf %19, %22 : vector<2x8x8xf32>
    %24 = math.exp %23 : vector<2x8x8xf32>
    %cst_8 = arith.constant dense<0.000000e+00> : vector<2x8xf32>
    %25 = vector.multi_reduction <add>, %24, %cst_8 [2] : vector<2x8x8xf32> to vector<2x8xf32>
    %26 = vector.shape_cast %25 : vector<2x8xf32> to vector<2x8x1xf32>
    %27 = tpu.reciprocal %26 {approx = true} : vector<2x8x1xf32> -> vector<2x8x1xf32>
    %28 = vector.broadcast %27 : vector<2x8x1xf32> to vector<2x8x8xf32>
    %29 = arith.mulf %24, %28 : vector<2x8x8xf32>
    %cst_9 = arith.constant dense<0.000000e+00> : vector<2x8xf32>
    %30 = vector.multi_reduction <add>, %29, %cst_9 [1] : vector<2x8x8xf32> to vector<2x8xf32>
    %31 = vector.shape_cast %30 : vector<2x8xf32> to vector<2x1x8xf32>
    %cst_10 = arith.constant 8.000000e+00 : f32
    %32 = vector.broadcast %cst_10 : f32 to vector<2x1x8xf32>
    %33 = arith.divf %31, %32 : vector<2x1x8xf32>
    "tpu.trace_start"() <{level = 10 : i32, message = "bqk,bkd->bqd"}> : () -> ()
    %cst_11 = arith.constant dense<0.000000e+00> : vector<2x1x8xf32>
    %34 = tpu.matmul %33, %16, %cst_11 {dimension_numbers = #tpu.dot_dimension_numbers<[2], [1], [1], [2], [0, 0, 0, 1, 1, 2], [0], [0]>} : vector<2x1x8xf32>, vector<2x8x8xf32>, vector<2x1x8xf32> -> vector<2x1x8xf32>
    "tpu.trace_stop"() : () -> ()
    %35 = vector.shape_cast %34 : vector<2x1x8xf32> to vector<2x8xf32>
    %36 = vector.extract_strided_slice %8 {offsets = [0, 8], sizes = [16, 8], strides = [1, 1]} : vector<16x32xf32> to vector<16x8xf32>
    %37 = vector.shape_cast %36 : vector<16x8xf32> to vector<2x8x8xf32>
    %38 = vector.extract_strided_slice %9 {offsets = [0, 8], sizes = [16, 8], strides = [1, 1]} : vector<16x32xf32> to vector<16x8xf32>
    %39 = vector.shape_cast %38 : vector<16x8xf32> to vector<2x8x8xf32>
    %40 = vector.extract_strided_slice %10 {offsets = [0, 8], sizes = [16, 8], strides = [1, 1]} : vector<16x32xf32> to vector<16x8xf32>
    %41 = vector.shape_cast %40 : vector<16x8xf32> to vector<2x8x8xf32>
    "tpu.trace_start"() <{level = 10 : i32, message = "bqd,bkd->bqk"}> : () -> ()
    %cst_12 = arith.constant dense<0.000000e+00> : vector<2x8x8xf32>
    %42 = tpu.matmul %37, %39, %cst_12 {dimension_numbers = #tpu.dot_dimension_numbers<[2], [2], [1], [1], [0, 0, 0, 1, 1, 1], [0], [0]>} : vector<2x8x8xf32>, vector<2x8x8xf32>, vector<2x8x8xf32> -> vector<2x8x8xf32>
    "tpu.trace_stop"() : () -> ()
    %cst_13 = arith.constant 0.353553385 : f32
    %43 = vector.broadcast %cst_13 : f32 to vector<2x8x8xf32>
    %44 = arith.mulf %42, %43 : vector<2x8x8xf32>
    %cst_14 = arith.constant dense<0xFF800000> : vector<2x8xf32>
    %45 = vector.multi_reduction <maximumf>, %44, %cst_14 [2] : vector<2x8x8xf32> to vector<2x8xf32>
    %46 = vector.shape_cast %45 : vector<2x8xf32> to vector<2x8x1xf32>
    %47 = vector.broadcast %46 : vector<2x8x1xf32> to vector<2x8x8xf32>
    %48 = arith.subf %44, %47 : vector<2x8x8xf32>
    %49 = math.exp %48 : vector<2x8x8xf32>
    %cst_15 = arith.constant dense<0.000000e+00> : vector<2x8xf32>
    %50 = vector.multi_reduction <add>, %49, %cst_15 [2] : vector<2x8x8xf32> to vector<2x8xf32>
    %51 = vector.shape_cast %50 : vector<2x8xf32> to vector<2x8x1xf32>
    %52 = tpu.reciprocal %51 {approx = true} : vector<2x8x1xf32> -> vector<2x8x1xf32>
    %53 = vector.broadcast %52 : vector<2x8x1xf32> to vector<2x8x8xf32>
    %54 = arith.mulf %49, %53 : vector<2x8x8xf32>
    %cst_16 = arith.constant dense<0.000000e+00> : vector<2x8xf32>
    %55 = vector.multi_reduction <add>, %54, %cst_16 [1] : vector<2x8x8xf32> to vector<2x8xf32>
    %56 = vector.shape_cast %55 : vector<2x8xf32> to vector<2x1x8xf32>
    %cst_17 = arith.constant 8.000000e+00 : f32
    %57 = vector.broadcast %cst_17 : f32 to vector<2x1x8xf32>
    %58 = arith.divf %56, %57 : vector<2x1x8xf32>
    "tpu.trace_start"() <{level = 10 : i32, message = "bqk,bkd->bqd"}> : () -> ()
    %cst_18 = arith.constant dense<0.000000e+00> : vector<2x1x8xf32>
    %59 = tpu.matmul %58, %41, %cst_18 {dimension_numbers = #tpu.dot_dimension_numbers<[2], [1], [1], [2], [0, 0, 0, 1, 1, 2], [0], [0]>} : vector<2x1x8xf32>, vector<2x8x8xf32>, vector<2x1x8xf32> -> vector<2x1x8xf32>
    "tpu.trace_stop"() : () -> ()
    %60 = vector.shape_cast %59 : vector<2x1x8xf32> to vector<2x8xf32>
    %61 = vector.extract_strided_slice %8 {offsets = [0, 16], sizes = [16, 8], strides = [1, 1]} : vector<16x32xf32> to vector<16x8xf32>
    %62 = vector.shape_cast %61 : vector<16x8xf32> to vector<2x8x8xf32>
    %63 = vector.extract_strided_slice %9 {offsets = [0, 16], sizes = [16, 8], strides = [1, 1]} : vector<16x32xf32> to vector<16x8xf32>
    %64 = vector.shape_cast %63 : vector<16x8xf32> to vector<2x8x8xf32>
    %65 = vector.extract_strided_slice %10 {offsets = [0, 16], sizes = [16, 8], strides = [1, 1]} : vector<16x32xf32> to vector<16x8xf32>
    %66 = vector.shape_cast %65 : vector<16x8xf32> to vector<2x8x8xf32>
    "tpu.trace_start"() <{level = 10 : i32, message = "bqd,bkd->bqk"}> : () -> ()
    %cst_19 = arith.constant dense<0.000000e+00> : vector<2x8x8xf32>
    %67 = tpu.matmul %62, %64, %cst_19 {dimension_numbers = #tpu.dot_dimension_numbers<[2], [2], [1], [1], [0, 0, 0, 1, 1, 1], [0], [0]>} : vector<2x8x8xf32>, vector<2x8x8xf32>, vector<2x8x8xf32> -> vector<2x8x8xf32>
    "tpu.trace_stop"() : () -> ()
    %cst_20 = arith.constant 0.353553385 : f32
    %68 = vector.broadcast %cst_20 : f32 to vector<2x8x8xf32>
    %69 = arith.mulf %67, %68 : vector<2x8x8xf32>
    %cst_21 = arith.constant dense<0xFF800000> : vector<2x8xf32>
    %70 = vector.multi_reduction <maximumf>, %69, %cst_21 [2] : vector<2x8x8xf32> to vector<2x8xf32>
    %71 = vector.shape_cast %70 : vector<2x8xf32> to vector<2x8x1xf32>
    %72 = vector.broadcast %71 : vector<2x8x1xf32> to vector<2x8x8xf32>
    %73 = arith.subf %69, %72 : vector<2x8x8xf32>
    %74 = math.exp %73 : vector<2x8x8xf32>
    %cst_22 = arith.constant dense<0.000000e+00> : vector<2x8xf32>
    %75 = vector.multi_reduction <add>, %74, %cst_22 [2] : vector<2x8x8xf32> to vector<2x8xf32>
    %76 = vector.shape_cast %75 : vector<2x8xf32> to vector<2x8x1xf32>
    %77 = tpu.reciprocal %76 {approx = true} : vector<2x8x1xf32> -> vector<2x8x1xf32>
    %78 = vector.broadcast %77 : vector<2x8x1xf32> to vector<2x8x8xf32>
    %79 = arith.mulf %74, %78 : vector<2x8x8xf32>
    %cst_23 = arith.constant dense<0.000000e+00> : vector<2x8xf32>
    %80 = vector.multi_reduction <add>, %79, %cst_23 [1] : vector<2x8x8xf32> to vector<2x8xf32>
    %81 = vector.shape_cast %80 : vector<2x8xf32> to vector<2x1x8xf32>
    %cst_24 = arith.constant 8.000000e+00 : f32
    %82 = vector.broadcast %cst_24 : f32 to vector<2x1x8xf32>
    %83 = arith.divf %81, %82 : vector<2x1x8xf32>
    "tpu.trace_start"() <{level = 10 : i32, message = "bqk,bkd->bqd"}> : () -> ()
    %cst_25 = arith.constant dense<0.000000e+00> : vector<2x1x8xf32>
    %84 = tpu.matmul %83, %66, %cst_25 {dimension_numbers = #tpu.dot_dimension_numbers<[2], [1], [1], [2], [0, 0, 0, 1, 1, 2], [0], [0]>} : vector<2x1x8xf32>, vector<2x8x8xf32>, vector<2x1x8xf32> -> vector<2x1x8xf32>
    "tpu.trace_stop"() : () -> ()
    %85 = vector.shape_cast %84 : vector<2x1x8xf32> to vector<2x8xf32>
    %86 = vector.extract_strided_slice %8 {offsets = [0, 24], sizes = [16, 8], strides = [1, 1]} : vector<16x32xf32> to vector<16x8xf32>
    %87 = vector.shape_cast %86 : vector<16x8xf32> to vector<2x8x8xf32>
    %88 = vector.extract_strided_slice %9 {offsets = [0, 24], sizes = [16, 8], strides = [1, 1]} : vector<16x32xf32> to vector<16x8xf32>
    %89 = vector.shape_cast %88 : vector<16x8xf32> to vector<2x8x8xf32>
    %90 = vector.extract_strided_slice %10 {offsets = [0, 24], sizes = [16, 8], strides = [1, 1]} : vector<16x32xf32> to vector<16x8xf32>
    %91 = vector.shape_cast %90 : vector<16x8xf32> to vector<2x8x8xf32>
    "tpu.trace_start"() <{level = 10 : i32, message = "bqd,bkd->bqk"}> : () -> ()
    %cst_26 = arith.constant dense<0.000000e+00> : vector<2x8x8xf32>
    %92 = tpu.matmul %87, %89, %cst_26 {dimension_numbers = #tpu.dot_dimension_numbers<[2], [2], [1], [1], [0, 0, 0, 1, 1, 1], [0], [0]>} : vector<2x8x8xf32>, vector<2x8x8xf32>, vector<2x8x8xf32> -> vector<2x8x8xf32>
    "tpu.trace_stop"() : () -> ()
    %cst_27 = arith.constant 0.353553385 : f32
    %93 = vector.broadcast %cst_27 : f32 to vector<2x8x8xf32>
    %94 = arith.mulf %92, %93 : vector<2x8x8xf32>
    %cst_28 = arith.constant dense<0xFF800000> : vector<2x8xf32>
    %95 = vector.multi_reduction <maximumf>, %94, %cst_28 [2] : vector<2x8x8xf32> to vector<2x8xf32>
    %96 = vector.shape_cast %95 : vector<2x8xf32> to vector<2x8x1xf32>
    %97 = vector.broadcast %96 : vector<2x8x1xf32> to vector<2x8x8xf32>
    %98 = arith.subf %94, %97 : vector<2x8x8xf32>
    %99 = math.exp %98 : vector<2x8x8xf32>
    %cst_29 = arith.constant dense<0.000000e+00> : vector<2x8xf32>
    %100 = vector.multi_reduction <add>, %99, %cst_29 [2] : vector<2x8x8xf32> to vector<2x8xf32>
    %101 = vector.shape_cast %100 : vector<2x8xf32> to vector<2x8x1xf32>
    %102 = tpu.reciprocal %101 {approx = true} : vector<2x8x1xf32> -> vector<2x8x1xf32>
    %103 = vector.broadcast %102 : vector<2x8x1xf32> to vector<2x8x8xf32>
    %104 = arith.mulf %99, %103 : vector<2x8x8xf32>
    %cst_30 = arith.constant dense<0.000000e+00> : vector<2x8xf32>
    %105 = vector.multi_reduction <add>, %104, %cst_30 [1] : vector<2x8x8xf32> to vector<2x8xf32>
    %106 = vector.shape_cast %105 : vector<2x8xf32> to vector<2x1x8xf32>
    %cst_31 = arith.constant 8.000000e+00 : f32
    %107 = vector.broadcast %cst_31 : f32 to vector<2x1x8xf32>
    %108 = arith.divf %106, %107 : vector<2x1x8xf32>
    "tpu.trace_start"() <{level = 10 : i32, message = "bqk,bkd->bqd"}> : () -> ()
    %cst_32 = arith.constant dense<0.000000e+00> : vector<2x1x8xf32>
    %109 = tpu.matmul %108, %91, %cst_32 {dimension_numbers = #tpu.dot_dimension_numbers<[2], [1], [1], [2], [0, 0, 0, 1, 1, 2], [0], [0]>} : vector<2x1x8xf32>, vector<2x8x8xf32>, vector<2x1x8xf32> -> vector<2x1x8xf32>
    "tpu.trace_stop"() : () -> ()
    %110 = vector.shape_cast %109 : vector<2x1x8xf32> to vector<2x8xf32>
    %111 = tpu.concatenate %35, %60, %85, %110 in 1 : vector<2x8xf32>, vector<2x8xf32>, vector<2x8xf32>, vector<2x8xf32> -> vector<2x32xf32>
    %c0_33 = arith.constant 0 : index
    %c0_34 = arith.constant 0 : index
    %112 = vector.load %arg3[%c0_33, %c0_34] : memref<32x128xf32, #tpu.memory_space<vmem>>, vector<32x128xf32>
    %cst_35 = arith.constant dense<0.000000e+00> : vector<2x128xf32>
    %113 = tpu.matmul %111, %112, %cst_35 {dimension_numbers = #tpu.dot_dimension_numbers<[1], [0], [0], [1], [0, 0, 1, 1], [], []>} : vector<2x32xf32>, vector<32x128xf32>, vector<2x128xf32> -> vector<2x128xf32>
    %c0_36 = arith.constant 0 : index
    %c0_37 = arith.constant 0 : index
    %114 = vector.load %arg4[%c0_36, %c0_37] : memref<1x128xf32, #tpu.memory_space<vmem>>, vector<1x128xf32>
    %115 = vector.shape_cast %114 : vector<1x128xf32> to vector<128xf32>
    %116 = vector.shape_cast %115 : vector<128xf32> to vector<1x128xf32>
    %117 = vector.broadcast %116 : vector<1x128xf32> to vector<2x128xf32>
    %118 = arith.addf %113, %117 : vector<2x128xf32>
    %c0_38 = arith.constant 0 : index
    %c0_39 = arith.constant 0 : index
    %119 = vector.load %arg5[%c0_38, %c0_39] : memref<2x128xf32, #tpu.memory_space<vmem>>, vector<2x128xf32>
    tpu.vector_store %arg5[%c0_38, %c0_39], %118 {strides = array<i32>} : memref<2x128xf32, #tpu.memory_space<vmem>>, vector<2x128xf32>,
    return
  }
}

</mosaic_0001>

<bundles_post_ra>
// kernel: tpu_custom_call.1
= control target key start
LH: loop header
LB: loop body
LE: loop exit
PB: predicated region body
PF: predicated region fallthrough
CT: control target
= control target key end

     0   :  { %10 = vsyncpa [#allocation3], 0  ;;  %s1180_s0 = inlined_call_operand.hbm [shape: f32[16,32], index: 0, kind: input, shape index: {}]   ;;  %s1181_s1 = inlined_call_operand.hbm [shape: f32[32,96], index: 1, kind: input, shape index: {}]   ;;  %s1182_s2 = inlined_call_operand.vmem [shape: f32[1,96], index: 2, kind: input, shape index: {}]   ;;  %s1183_s3 = inlined_call_operand.hbm [shape: f32[32,128], index: 3, kind: input, shape index: {}]   ;;  %s1184_s4 = inlined_call_operand.vmem [shape: f32[1,128], index: 4, kind: input, shape index: {}]   ;;  %s1185_s5 = inlined_call_operand.hbm [shape: f32[2,128], index: 5, kind: output, shape index: {}]  }
   0x1   :  { %11 = vsyncpa [#allocation6], 0 }
   0x2   :  { %12 = vsyncpa [#allocation4], 0  ;;  %s30_s20 = sshll.u32 %s1181_s1, 4  ;;  %s978_s21 = smov [#allocation5]   ;;  %s31_s20 = int_to_ptr.hbm [resolvable:$true] %s30_s20 }
   0x3   :  { %s32_s22 = sshll.u32 %s978_s21, 4  ;;  %s17_s25 = sshll.u32 %s1180_s0, 4  ;;  %s33_s22 = int_to_ptr.vmem [resolvable:$true] %s32_s22  ;;  %s18_s25 = int_to_ptr.hbm [resolvable:$true] %s17_s25 }
   0x4   :  { %s979_s26 = smov 128   ;;  %s980_s27 = smov 8  }
   0x5   :  { %38 = dma.hbm_to_vmem [thread:$0]  %s31_s20, 512, %s33_s22, [#allocation6], %s979_s26, %s979_s26, %s980_s27  }
   0x6   :  { %s981_s28 = smov [#allocation2]   ;;  %s45_s7 = sshll.u32 %s1183_s3, 4  ;;  %s46_s7 = int_to_ptr.hbm [resolvable:$true] %s45_s7 }
   0x7   :  { %s19_s29 = sshll.u32 %s981_s28, 4  ;;  %s982_s1 = smov [#allocation7]   ;;  %s20_s29 = int_to_ptr.vmem [resolvable:$true] %s19_s29 }
   0x8   :  { %25 = dma.hbm_to_vmem [thread:$0]  %s18_s25, 256, %s20_s29, [#allocation3], %s979_s26, %s979_s26, %s980_s27  }
   0x9   :  { %s47_s8 = sshll.u32 %s982_s1, 4  ;;  %s48_s8 = int_to_ptr.vmem [resolvable:$true] %s47_s8 }
   0xa   :  { %53 = dma.hbm_to_vmem [thread:$0]  %s46_s7, 512, %s48_s8, [#allocation6], %s979_s26, %s979_s26, %s980_s27  }
   0xb   :  { %972 = dma.done.wait [#allocation3], 256  }
   0xc   :  { %973 = vsyncadd [#allocation3], 4294967040 }
   0xd   :  { %974 = dma.done.wait [#allocation6], 1024  }
   0xe   :  { %975 = vsyncadd [#allocation6], 4294966272  ;;  %v73_v0 = vld [vmem:[#allocation5 + $0x18] sm:$0xff]  ;;  %v72_v1 = vld [vmem:[#allocation5 + $0x10] sm:$0xff]  ;;  %vm78_vm0 = vcmask 261120   ;;  %s983_s9 = smov 88  }
   0xf   :  { %97 = vmatpush.msra.mxu0 %v73_v0  ;;  %v71_v2 = vld [vmem:[#allocation5 + $0x8] sm:$0xff]  ;;  %v70_v3 = vld [vmem:[#allocation5] sm:$0xff]  ;;  %v68_v4 = vld [vmem:[#allocation2] sm:$0xff]  ;;  %s984_s10 = smov 96   ;;  %s985_s11 = smov 80   ;;  %vm111_vm1 = vcmask 64512  }
  0x10   :  { %v69_v5 = vld [vmem:[#allocation2 + $0x8] sm:$0xff]  ;;  %v840_v6 = vld [vmem:[%s1182_s2] ss:$0 sm:$0xff]  ;;  %s986_s2 = smov 120   ;;  %s987_s12 = smov 72   ;;  %vm709_vm3 = vcmask 1041409  }
  0x11   :  { %98 = vmatpush.msra.mxu0 %v72_v1  ;;  %s988_s13 = smov 112   ;;  %s989_s14 = smov 104   ;;  %vm734_vm4 = vcmask 130048   ;;  %vm736_vm5 = vcmask 195584  }
  0x12   :  { %s990_s15 = smov 64   ;;  %s991_s16 = smov 48  }
  0x13   :  { %99 = vmatpush.msra.mxu0 %v71_v2  ;;  %s992_s17 = smov 40   ;;  %s993_s18 = smov 56  }
  0x14   :  { %s995_s19 = smov 16   ;;  %s996_s20 = smov 24  }
  0x15   :  { %100 = vmatpush.msra.mxu0 %v70_v3  ;;  %s997_s23 = smov [#allocation8]  }
  0x16   :  { %788 = vmatmul.msk.f32.vlgmr.msra.gmra.mxu0 %vm78_vm0, %v68_v4  ;;  %s775_s24 = sshll.u32 %s997_s23, 4  ;;  %s776_s24 = int_to_ptr.vmem [resolvable:$true] %s775_s24 }
  0x1e   :  { %789 = vmatmul.msk.f32.gmra.mxu0 %vm78_vm0, %v69_v5 }
  0x93   :  { %v102_v7 = vpop.f32.mrf.mxu0 }
  0x94   :  { %v1045_v8 = vadd.f32 %v840_v6, %v102_v7 }
  0x96   :  { %264 = vrot.lane.b32.xlu2 %v1045_v8, %s983_s9  ;;  %109 = vrot.lane.b32.xlu0 %v1045_v8, %s984_s10 }
  0x9b   :  { %v105_v9 = vpop.f32.mrf.mxu0 }
  0x9c   :  { %v1049_v10 = vadd.f32 %v840_v6, %v105_v9 }
  0x9e   :  { %292 = vrot.lane.b32.xlu1 %v1049_v10, %s983_s9  ;;  %412 = vrot.lane.b32.xlu2 %v1045_v8, %s985_s11  ;;  %v835_v49 = vpack.i.bf16 %v1049_v10, %v1045_v8 }
  0x9f   :  { %137 = vrot.lane.b32.xlu0 %v1049_v10, %s984_s10 }
  0xa6   :  { %290 = vrot.lane.b32.xlu1 %v1049_v10, %s986_s2  ;;  %560 = vrot.lane.b32.xlu2 %v1045_v8, %s987_s12 }
  0xa7   :  { %262 = vrot.lane.b32.xlu0 %v1045_v8, %s986_s2 }
  0xae   :  { %410 = vrot.lane.b32.xlu1 %v1045_v8, %s988_s13  ;;  %438 = vrot.lane.b32.xlu2 %v1049_v10, %s988_s13 }
  0xaf   :  { %440 = vrot.lane.b32.xlu0 %v1049_v10, %s985_s11 }
  0xb6   :  { %558 = vrot.lane.b32.xlu1 %v1045_v8, %s989_s14 }
  0xb7   :  { %588 = vrot.lane.b32.xlu0 %v1049_v10, %s987_s12 }
  0xbe   :  { %586 = vrot.lane.b32.xlu1 %v1049_v10, %s989_s14 }
  0xf0   :  { %v265_v11 = vpop.permute.xlu2 %264 }
  0xf8   :  { %v413_v13 = vpop.permute.xlu2 %412 }
 0x100   :  { %v561_v18 = vpop.permute.xlu2 %560 }
 0x108   :  { %v110_v12 = vpop.permute.xlu0 %109  ;;  %v439_v21 = vpop.permute.xlu2 %438 }
 0x109   :  { %790 = vmatpush.xpose.msk.msra.mxu1 %vm111_vm1, %v110_v12 }
 0x10c   :  { %791 = vmatmul.msk.f32.vlgmr.msra.gmra.mxu1 %vm111_vm1, %v1045_v8 }
 0x10d   :  { %796 = vmatpush.xpose.msk.msrb.mxu1 %vm111_vm1, %v265_v11 }
 0x110   :  { %v293_v14 = vpop.permute.xlu1 %292 }
 0x111   :  { %v138_v15 = vpop.permute.xlu0 %137 }
 0x112   :  { %792 = vmatpush.xpose.msk.msra.mxu2 %vm111_vm1, %v138_v15 }
 0x115   :  { %793 = vmatmul.msk.f32.vlgmr.msra.gmra.mxu2 %vm111_vm1, %v1049_v10 }
 0x116   :  { %798 = vmatpush.xpose.msk.msrb.mxu2 %vm111_vm1, %v293_v14 }
 0x118   :  { %v291_v16 = vpop.permute.xlu1 %290 }
 0x119   :  { %v263_v17 = vpop.permute.xlu0 %262 }
 0x11a   :  { %802 = vmatpush.xpose.msk.msra.mxu2 %vm111_vm1, %v413_v13  ;;  %797 = vmatmul.msk.f32.vlgmr.msrb.gmra.mxu1 %vm111_vm1, %v263_v17 }
 0x11d   :  { %799 = vmatmul.msk.f32.vlgmr.msrb.gmra.mxu2 %vm111_vm1, %v291_v16 }
 0x11e   :  { %808 = vmatpush.xpose.msk.msrb.mxu2 %vm111_vm1, %v561_v18 }
 0x120   :  { %v411_v19 = vpop.permute.xlu1 %410 }
 0x121   :  { %v441_v20 = vpop.permute.xlu0 %440 }
 0x122   :  { %804 = vmatpush.xpose.msk.msrb.mxu0 %vm111_vm1, %v441_v20 }
 0x125   :  { %803 = vmatmul.msk.f32.vlgmr.msra.gmra.mxu2 %vm111_vm1, %v411_v19  ;;  %805 = vmatmul.msk.f32.vlgmr.msrb.gmra.mxu0 %vm111_vm1, %v439_v21 }
 0x128   :  { %v559_v22 = vpop.permute.xlu1 %558 }
 0x129   :  { %v589_v23 = vpop.permute.xlu0 %588 }
 0x12a   :  { %810 = vmatpush.xpose.msk.msra.mxu0 %vm111_vm1, %v589_v23 }
 0x12d   :  { %809 = vmatmul.msk.f32.vlgmr.msrb.gmra.mxu2 %vm111_vm1, %v559_v22 }
 0x130   :  { %v587_v24 = vpop.permute.xlu1 %586 }
 0x131   :  { %811 = vmatmul.msk.f32.vlgmr.msra.gmra.mxu0 %vm111_vm1, %v587_v24 }
 0x189   :  { %v133_v25 = vpop.f32.mrf.mxu1 }
 0x18a   :  { %v163_v26 = vmul.f32 0.35355338, %v133_v25 }
 0x18c   :  { %v165_v27 = vsel %vm111_vm1, %v163_v26, -inf }
 0x18d   :  { %166 = vmax.xlane.f32.xlu2 %v165_v27 }
 0x197   :  { %v287_v28 = vpop.f32.mrf.mxu1 }
 0x198   :  { %v318_v29 = vmul.f32 0.35355338, %v287_v28  ;;  %v160_v30 = vpop.f32.mrf.mxu2 }
 0x199   :  { %v164_v31 = vmul.f32 0.35355338, %v160_v30 }
 0x19a   :  { %v320_v32 = vsel %vm111_vm1, %v318_v29, -inf }
 0x19b   :  { %321 = vmax.xlane.f32.xlu1 %v320_v32  ;;  %v168_v33 = vsel %vm111_vm1, %v164_v31, -inf }
 0x19c   :  { %169 = vmax.xlane.f32.xlu0 %v168_v33 }
 0x1a0   :  { %v315_v34 = vpop.f32.mrf.mxu2 }
 0x1a1   :  { %v1084_v35 = vmul.f32 0.35355338, %v315_v34 }
 0x1a2   :  { %v463_v36 = vpop.f32.mrf.mxu0 }
 0x1a3   :  { %v467_v37 = vmul.f32 0.35355338, %v463_v36  ;;  %v323_v38 = vsel %vm111_vm1, %v1084_v35, -inf }
 0x1a4   :  { %324 = vmax.xlane.f32.xlu2 %v323_v38 }
 0x1a5   :  { %v471_v39 = vsel %vm111_vm1, %v467_v37, -inf }
 0x1a6   :  { %472 = vmax.xlane.f32.xlu0 %v471_v39 }
 0x1a8   :  { %v435_v40 = vpop.f32.mrf.mxu2 }
 0x1a9   :  { %v466_v41 = vmul.f32 0.35355338, %v435_v40 }
 0x1ab   :  { %v468_v42 = vsel %vm111_vm1, %v466_v41, -inf }
 0x1ac   :  { %469 = vmax.xlane.f32.xlu2 %v468_v42 }
 0x1ae   :  { %v611_v43 = vpop.f32.mrf.mxu0 }
 0x1af   :  { %v615_v44 = vmul.f32 0.35355338, %v611_v43 }
 0x1b0   :  { %v583_v45 = vpop.f32.mrf.mxu2 }
 0x1b1   :  { %v614_v46 = vmul.f32 0.35355338, %v583_v45  ;;  %v619_v47 = vsel %vm111_vm1, %v615_v44, -inf }
 0x1b3   :  { %v616_v48 = vsel %vm111_vm1, %v614_v46, -inf }
 0x1b4   :  { %617 = vmax.xlane.f32.xlu1 %v616_v48  ;;  %620 = vmax.xlane.f32.xlu2 %v619_v47 }
 0x1cd   :  { %836 = vrot.lane.b32.xlu1 %v835_v49, %s990_s15 }
 0x200   :  { %v167_v50 = vpop.xlane.xlu2 %166 }
 0x201   :  { %v171_v51 = vsub.f32 %v163_v26, %v167_v50 }
 0x203   :  { %v173_v52 = vmul.f32 1.442695, %v171_v51 }
 0x205   :  { %842 = vpow2.f32 %v173_v52 }
 0x20b   :  { %v1094_v53 = vpop.eup %842 }
 0x20c   :  { %v177_v54 = vsel %vm111_vm1, %v1094_v53, 0.0 }
 0x20d   :  { %178 = vadd.xlane.f32.xlu0 %v177_v54 }
 0x20e   :  { %v322_v55 = vpop.xlane.xlu1 %321 }
 0x20f   :  { %v326_v56 = vsub.f32 %v318_v29, %v322_v55  ;;  %v170_v57 = vpop.xlane.xlu0 %169 }
 0x210   :  { %v172_v58 = vsub.f32 %v164_v31, %v170_v57  ;;  %v994_v31 = vmov 8.0  }
 0x211   :  { %v328_v59 = vmul.f32 1.442695, %v326_v56 }
 0x212   :  { %v175_v60 = vmul.f32 1.442695, %v172_v58 }
 0x213   :  { %844 = vpow2.f32 %v328_v59 }
 0x214   :  { %846 = vpow2.f32 %v175_v60 }
 0x217   :  { %v325_v61 = vpop.xlane.xlu2 %324 }
 0x218   :  { %v327_v19 = vsub.f32 %v1084_v35, %v325_v61 }
 0x219   :  { %v1098_v62 = vpop.eup %844  ;;  %v473_v63 = vpop.xlane.xlu0 %472 }
 0x21a   :  { %v1100_v0 = vpop.eup %846  ;;  %v475_v1 = vsub.f32 %v467_v37, %v473_v63  ;;  %v332_v2 = vsel %vm111_vm1, %v1098_v62, 0.0  ;;  %v330_v21 = vmul.f32 1.442695, %v327_v19 }
 0x21b   :  { %333 = vadd.xlane.f32.xlu2 %v332_v2  ;;  %v180_v3 = vsel %vm111_vm1, %v1100_v0, 0.0 }
 0x21c   :  { %v478_v4 = vmul.f32 1.442695, %v475_v1  ;;  %181 = vadd.xlane.f32.xlu1 %v180_v3 }
 0x21e   :  { %848 = vpow2.f32 %v478_v4 }
 0x21f   :  { %v470_v5 = vpop.xlane.xlu2 %469 }
 0x220   :  { %v474_v6 = vsub.f32 %v466_v41, %v470_v5 }
 0x222   :  { %v476_v7 = vmul.f32 1.442695, %v474_v6 }
 0x224   :  { %v1106_v9 = vpop.eup %848  ;;  %850 = vpow2.f32 %v476_v7 }
 0x225   :  { %v483_v11 = vsel %vm111_vm1, %v1106_v9, 0.0 }
 0x226   :  { %484 = vadd.xlane.f32.xlu0 %v483_v11 }
 0x227   :  { %v618_v12 = vpop.xlane.xlu1 %617  ;;  %v621_v13 = vpop.xlane.xlu2 %620 }
 0x228   :  { %v622_v14 = vsub.f32 %v614_v46, %v618_v12  ;;  %v623_v15 = vsub.f32 %v615_v44, %v621_v13 }
 0x22a   :  { %v1110_v16 = vpop.eup %850  ;;  %v624_v17 = vmul.f32 1.442695, %v622_v14  ;;  %v626_v18 = vmul.f32 1.442695, %v623_v15 }
 0x22b   :  { %v480_v20 = vsel %vm111_vm1, %v1110_v16, 0.0 }
 0x22c   :  { %852 = vpow2.f32 %v624_v17  ;;  %481 = vadd.xlane.f32.xlu2 %v480_v20 }
 0x22d   :  { %854 = vpow2.f32 %v626_v18 }
 0x22e   :  { %856 = vpow2.f32 %v330_v21 }
 0x22f   :  { %858 = vrcp.f32 %v994_v31 }
 0x232   :  { %v1115_v22 = vpop.eup %852 }
 0x233   :  { %v1117_v23 = vpop.eup %854  ;;  %v628_v24 = vsel %vm111_vm1, %v1115_v22, 0.0 }
 0x234   :  { %629 = vadd.xlane.f32.xlu2 %v628_v24  ;;  %v631_v25 = vsel %vm111_vm1, %v1117_v23, 0.0  ;;  %v1124_v26 = vpop.eup %856 }
 0x235   :  { %632 = vadd.xlane.f32.xlu0 %v631_v25  ;;  %506 = vrot.lane.b32.xlu1 %v1045_v8, %s991_s16  ;;  %v335_v27 = vsel %vm111_vm1, %v1124_v26, 0.0  ;;  %v859_v33 = vpop.eup %858 }
 0x236   :  { %v202_v34 = vmul.f32 8.0, %v859_v33  ;;  %vm206_vm2 = vweird.f32 %v859_v33 }
 0x238   :  { %v203_v37 = vsub.f32 1.0, %v202_v34 }
 0x23a   :  { %v204_v40 = vmul.f32 %v859_v33, %v203_v37 }
 0x23d   :  { %336 = vadd.xlane.f32.xlu0 %v335_v27  ;;  %532 = vrot.lane.b32.xlu1 %v1049_v10, %s991_s16 }
 0x23f   :  { %v837_v28 = vpop.permute.xlu1 %836 }
 0x240   :  { %v838_v29 = vunpack.i.l.bf16 %v837_v28  ;;  %v839_v30 = vunpack.i.h.bf16 %v837_v28 }
 0x242   :  { %231 = vmatpush.msra.mxu3 %v838_v29 }
 0x244   :  { %257 = vmatpush.msrb.mxu3 %v839_v30 }
 0x245   :  { %654 = vrot.lane.b32.xlu1 %v1045_v8, %s992_s17 }
 0x24c   :  { %358 = vrot.lane.b32.xlu2 %v1045_v8, %s993_s18 }
 0x251   :  { %384 = vrot.lane.b32.xlu0 %v1049_v10, %s993_s18 }
 0x259   :  { %680 = vrot.lane.b32.xlu0 %v1049_v10, %s992_s17  ;;  %v205_v10 = vadd.f32 %v859_v33, %v204_v40 }
 0x25b   :  { %v1135_v46 = vsel %vm206_vm2, %v859_v33, %v205_v10 }
 0x280   :  { %v179_v32 = vpop.xlane.xlu0 %178 }
 0x281   :  { %860 = vrcp.f32 %v179_v32 }
 0x287   :  { %v861_v35 = vpop.eup %860 }
 0x288   :  { %v185_v36 = vmul.f32 %v861_v35, %v1094_v53 }
 0x28a   :  { %v187_v38 = vsel %vm111_vm1, %v185_v36, 0.0 }
 0x28b   :  { %v188_v39 = vrot.slane %v187_v38, 4 }
 0x28d   :  { %v189_v41 = vadd.f32 %v188_v39, %v187_v38 }
 0x28e   :  { %v334_v8 = vpop.xlane.xlu2 %333 }
 0x28f   :  { %862 = vrcp.f32 %v334_v8  ;;  %v182_v42 = vpop.xlane.xlu1 %181  ;;  %v190_v43 = vrot.slane %v189_v41, 2 }
 0x290   :  { %864 = vrcp.f32 %v182_v42 }
 0x291   :  { %v191_v44 = vadd.f32 %v190_v43, %v189_v41 }
 0x293   :  { %v192_v45 = vrot.slane %v191_v44, 1 }
 0x295   :  { %v863_v47 = vpop.eup %862  ;;  %v193_v48 = vadd.f32 %v192_v45, %v191_v44 }
 0x296   :  { %v865_v49 = vpop.eup %864  ;;  %v340_v50 = vmul.f32 %v863_v47, %v1098_v62 }
 0x297   :  { %v186_v51 = vmul.f32 %v865_v49, %v1100_v0  ;;  %v208_v52 = vmul.f32 %v1135_v46, %v193_v48 }
 0x298   :  { %v342_v53 = vsel %vm111_vm1, %v340_v50, 0.0 }
 0x299   :  { %v343_v54 = vrot.slane %v342_v53, 4  ;;  %v194_v55 = vsel %vm111_vm1, %v186_v51, 0.0  ;;  %794 = vmatmul.msk.f32.vlgmr.msra.gmra.mxu3 %vm111_vm1, %v208_v52  ;;  %v485_v63 = vpop.xlane.xlu0 %484 }
 0x29a   :  { %v195_v56 = vrot.slane %v194_v55, 4 }
 0x29b   :  { %v344_v57 = vadd.f32 %v343_v54, %v342_v53 }
 0x29c   :  { %v196_v58 = vadd.f32 %v195_v56, %v194_v55 }
 0x29d   :  { %v345_v60 = vrot.slane %v344_v57, 2 }
 0x29e   :  { %v197_v59 = vrot.slane %v196_v58, 2 }
 0x29f   :  { %v482_v61 = vpop.xlane.xlu2 %481  ;;  %v346_v0 = vadd.f32 %v345_v60, %v344_v57 }
 0x2a0   :  { %866 = vrcp.f32 %v482_v61  ;;  %v198_v62 = vadd.f32 %v197_v59, %v196_v58 }
 0x2a1   :  { %v347_v5 = vrot.slane %v346_v0, 1  ;;  %868 = vrcp.f32 %v485_v63 }
 0x2a2   :  { %v199_v1 = vrot.slane %v198_v62, 1 }
 0x2a3   :  { %v348_v15 = vadd.f32 %v347_v5, %v346_v0 }
 0x2a4   :  { %v200_v2 = vadd.f32 %v199_v1, %v198_v62 }
 0x2a6   :  { %v867_v3 = vpop.eup %866  ;;  %v209_v4 = vmul.f32 %v1135_v46, %v200_v2 }
 0x2a7   :  { %v488_v6 = vmul.f32 %v867_v3, %v1110_v16  ;;  %v630_v7 = vpop.xlane.xlu2 %629  ;;  %v507_v11 = vpop.permute.xlu1 %506  ;;  %v356_v16 = vmul.f32 %v348_v15, %v1135_v46 }
 0x2a8   :  { %870 = vrcp.f32 %v630_v7  ;;  %v633_v12 = vpop.xlane.xlu0 %632  ;;  %795 = vmatmul.msk.f32.vlgmr.msrb.gmra.mxu3 %vm111_vm1, %v209_v4  ;;  %v869_v18 = vpop.eup %868 }
 0x2a9   :  { %v490_v13 = vsel %vm111_vm1, %v488_v6, 0.0  ;;  %872 = vrcp.f32 %v633_v12  ;;  %v489_v27 = vmul.f32 %v869_v18, %v1106_v9 }
 0x2aa   :  { %v491_v14 = vrot.slane %v490_v13, 4 }
 0x2ac   :  { %v492_v17 = vadd.f32 %v491_v14, %v490_v13 }
 0x2ae   :  { %v871_v19 = vpop.eup %870  ;;  %v493_v20 = vrot.slane %v492_v17, 2 }
 0x2af   :  { %v636_v21 = vmul.f32 %v871_v19, %v1115_v22  ;;  %v359_v24 = vpop.permute.xlu2 %358  ;;  %v533_v25 = vpop.permute.xlu1 %532  ;;  %v497_v22 = vsel %vm111_vm1, %v489_v27, 0.0  ;;  %v738_v27 = vld [vmem:[#allocation7] sm:$0xff] }
 0x2b0   :  { %v494_v28 = vadd.f32 %v493_v20, %v492_v17  ;;  %v337_v29 = vpop.xlane.xlu0 %336  ;;  %379 = vmatpush.msra.mxu3 %v359_v24  ;;  %v873_v35 = vpop.eup %872  ;;  %v498_v38 = vrot.slane %v497_v22, 4  ;;  %v741_v24 = vld [vmem:[#allocation7 + $0x18] sm:$0xff] }
 0x2b1   :  { %v638_v30 = vsel %vm111_vm1, %v636_v21, 0.0  ;;  %874 = vrcp.f32 %v337_v29  ;;  %800 = vmatmul.msk.f32.vlgmr.msra.gmra.mxu3 %vm111_vm1, %v356_v16  ;;  %v637_v41 = vmul.f32 %v873_v35, %v1117_v23  ;;  %761 = vmatpush.msra.mxu2 %v741_v24  ;;  %v739_v16 = vld [vmem:[#allocation7 + $0x8] sm:$0xff] }
 0x2b2   :  { %v495_v31 = vrot.slane %v494_v28, 1  ;;  %v639_v32 = vrot.slane %v638_v30, 4  ;;  %527 = vmatpush.msrb.mxu3 %v507_v11  ;;  %v499_v10 = vadd.f32 %v498_v38, %v497_v22 }
 0x2b3   :  { %v645_v45 = vsel %vm111_vm1, %v637_v41, 0.0 }
 0x2b4   :  { %v640_v33 = vadd.f32 %v639_v32, %v638_v30  ;;  %v496_v34 = vadd.f32 %v495_v31, %v494_v28  ;;  %v500_v50 = vrot.slane %v499_v10, 2  ;;  %v646_v51 = vrot.slane %v645_v45, 4 }
 0x2b6   :  { %v641_v36 = vrot.slane %v640_v33, 2  ;;  %v504_v37 = vmul.f32 %v496_v34, %v1135_v46  ;;  %v647_v53 = vadd.f32 %v646_v51, %v645_v45 }
 0x2b7   :  { %v875_v9 = vpop.eup %874  ;;  %v655_v39 = vpop.permute.xlu1 %654 }
 0x2b8   :  { %v642_v40 = vadd.f32 %v641_v36, %v640_v33  ;;  %v341_v8 = vmul.f32 %v875_v9, %v1124_v26  ;;  %675 = vmatpush.msra.mxu3 %v655_v39  ;;  %v501_v26 = vadd.f32 %v500_v50, %v499_v10  ;;  %v648_v58 = vrot.slane %v647_v53, 2  ;;  %v841_v33 = vld [vmem:[%s1184_s4] ss:$0 sm:$0xff] }
 0x2b9   :  { %806 = vmatmul.msk.f32.vlgmr.msrb.gmra.mxu3 %vm111_vm1, %v504_v37 }
 0x2ba   :  { %v643_v42 = vrot.slane %v642_v40, 1  ;;  %v349_v43 = vsel %vm111_vm1, %v341_v8, 0.0  ;;  %v502_v57 = vrot.slane %v501_v26, 1  ;;  %v649_v60 = vadd.f32 %v648_v58, %v647_v53 }
 0x2bb   :  { %v350_v44 = vrot.slane %v349_v43, 4 }
 0x2bc   :  { %v644_v47 = vadd.f32 %v643_v42, %v642_v40  ;;  %v503_v63 = vadd.f32 %v502_v57, %v501_v26  ;;  %v650_v62 = vrot.slane %v649_v60, 1 }
 0x2bd   :  { %v351_v48 = vadd.f32 %v350_v44, %v349_v43 }
 0x2be   :  { %v652_v49 = vmul.f32 %v644_v47, %v1135_v46  ;;  %v505_v1 = vmul.f32 %v503_v63, %v1135_v46  ;;  %v651_v0 = vadd.f32 %v650_v62, %v649_v60 }
 0x2bf   :  { %v352_v52 = vrot.slane %v351_v48, 2 }
 0x2c0   :  { %v653_v2 = vmul.f32 %v651_v0, %v1135_v46 }
 0x2c1   :  { %v353_v23 = vadd.f32 %v352_v52, %v351_v48  ;;  %812 = vmatmul.msk.f32.vlgmr.msra.gmra.mxu3 %vm111_vm1, %v652_v49 }
 0x2c3   :  { %v354_v54 = vrot.slane %v353_v23, 1  ;;  %v385_v55 = vpop.permute.xlu0 %384 }
 0x2c4   :  { %405 = vmatpush.msra.mxu1 %v385_v55 }
 0x2c5   :  { %v355_v56 = vadd.f32 %v354_v54, %v353_v23 }
 0x2c6   :  { %553 = vmatpush.msrb.mxu1 %v533_v25  ;;  %v740_v25 = vld [vmem:[#allocation7 + $0x10] sm:$0xff] }
 0x2c7   :  { %v357_v59 = vmul.f32 %v355_v56, %v1135_v46  ;;  %762 = vmatpush.msra.mxu2 %v740_v25 }
 0x2c9   :  { %801 = vmatmul.msk.f32.vlgmr.msra.gmra.mxu1 %vm111_vm1, %v357_v59  ;;  %763 = vmatpush.msra.mxu2 %v739_v16 }
 0x2cb   :  { %v681_v61 = vpop.permute.xlu0 %680  ;;  %764 = vmatpush.msra.mxu2 %v738_v27 }
 0x2cc   :  { %701 = vmatpush.msra.mxu1 %v681_v61 }
 0x2d1   :  { %807 = vmatmul.msk.f32.vlgmr.msrb.gmra.mxu1 %vm111_vm1, %v505_v1 }
 0x2d9   :  { %813 = vmatmul.msk.f32.vlgmr.msra.gmra.mxu1 %vm111_vm1, %v653_v2 }
 0x31c   :  { %v233_v3 = vpop.f32.mrf.mxu3 }
 0x32b   :  { %v259_v4 = vpop.f32.mrf.mxu3 }
 0x32c   :  { %v708_v5 = vrot.slane %v259_v4, 7 }
 0x32e   :  { %v710_v6 = vsel %vm709_vm3, %v708_v5, %v233_v3 }
 0x334   :  { %v381_v7 = vpop.f32.mrf.mxu3 }
 0x33c   :  { %v529_v14 = vpop.f32.mrf.mxu3 }
 0x344   :  { %v677_v20 = vpop.f32.mrf.mxu3 }
 0x346   :  { %v407_v11 = vpop.f32.mrf.mxu1 }
 0x347   :  { %v714_v12 = vrot.slane %v407_v11, 7 }
 0x349   :  { %v715_v13 = vsel %vm709_vm3, %v714_v12, %v381_v7 }
 0x34a   :  { %716 = vrot.lane.b32.xlu2 %v715_v13, %s980_s27  ;;  %s777_s27 = sshll.u32 %s1185_s5, 4  ;;  %s778_s27 = int_to_ptr.hbm [resolvable:$true] %s777_s27 }
 0x34e   :  { %v555_v15 = vpop.f32.mrf.mxu1 }
 0x34f   :  { %v721_v17 = vrot.slane %v555_v15, 7 }
 0x351   :  { %v722_v46 = vsel %vm709_vm3, %v721_v17, %v529_v14 }
 0x352   :  { %723 = vrot.lane.b32.xlu1 %v722_v46, %s995_s19 }
 0x356   :  { %v703_v18 = vpop.f32.mrf.mxu1 }
 0x357   :  { %v728_v19 = vrot.slane %v703_v18, 7 }
 0x359   :  { %v729_v21 = vsel %vm709_vm3, %v728_v19, %v677_v20 }
 0x35a   :  { %730 = vrot.lane.b32.xlu0 %v729_v21, %s996_s20 }
 0x3a4   :  { %v717_v28 = vpop.permute.xlu2 %716 }
 0x3a5   :  { %v733_v30 = vsel %vm111_vm1, %v710_v6, %v717_v28 }
 0x3c4   :  { %v724_v29 = vpop.permute.xlu1 %723 }
 0x3c5   :  { %v735_v31 = vsel %vm734_vm4, %v733_v30, %v724_v29 }
 0x3cc   :  { %v731_v32 = vpop.permute.xlu0 %730 }
 0x3cd   :  { %v737_v22 = vsel %vm736_vm5, %v735_v31, %v731_v32 }
 0x3ce   :  { %814 = vmatmul.msk.f32.vlgmr.msra.gmra.mxu2 %vm78_vm0, %v737_v22 }
 0x451   :  { %v766_v34 = vpop.f32.mrf.mxu2 }
 0x452   :  { %v767_v35 = vadd.f32 %v841_v33, %v766_v34 }
 0x454   :  { %769 = vst [vmem:[#allocation8] sm:$0x3] %v767_v35 }
 0x455   :  { %780 = dma.vmem_to_hbm [thread:$0]  %s776_s24, 32, %s778_s27, [#allocation4]  }
 0x456   :  { %976 = dma.done.wait [#allocation4], 32  }
 0x457   :  { %977 = vsyncadd [#allocation4], 4294967264 }
 0x458   :  { %785 = vsyncpa [#allocation3], 1 }
 0x459   :  { %786 = vsyncpa [#allocation6], 1 }
 0x45a   :  { %787 = vsyncpa [#allocation4], 1 }

</bundles_post_ra>
